<compile_context>
chip_gen: v6e
topology: v6e:2x2x1
jax: 0.10.0
libtpu: 0.0.40
codegen_flags: <defaults>
</compile_context>

<pallas_src>
import math

import numpy as np

import jax
import jax.numpy as jnp
from jax import lax
from jax.experimental import pallas as pl
from jax.experimental.pallas import tpu as pltpu


_MASK_VALUE = -1e30   # large finite negative: avoids inf-inf NaN corners
_LANE = 128


def _round_up(x: int, m: int) -> int:
    return ((x + m - 1) // m) * m


def _tpu_vmem_capacity_bytes() -> int:
    try:
        return int(pltpu.get_tpu_info().vmem_capacity_bytes)
    except Exception:
        return 64 << 20            # conservative fallback (v7x physical VMEM)


def _vmem_limit_bytes(cap: int) -> int:
    # 3/4 of physical VMEM, capped at 100 MiB: ~48 MiB on v7x, ~96 MiB on v5e/v6e.
    return max(32 << 20, min((cap * 3) // 4, 100 << 20))


def _seq_tile(t: int, cap: int) -> int:
    """Multiple-of-8 sequence tile; big tiles on 128-MiB-VMEM chips, minimal padding."""
    target = 512 if cap >= (100 << 20) else 256
    n_tiles = max(1, -(-t // target))              # ceil(t / target)
    return min(target, _round_up(-(-t // n_tiles), 8))


# --------------------------- kernel 1: fused QKV projection ---------------------------
def _make_qkv_kernel(num_heads: int, head_dim: int, scale: float):
    def qkv_kernel(x_ref, w_ref, q_ref, k_ref, v_ref):
        # x_ref: (t_seq, d_in) bf16; w_ref: (H, d_in, 3*hd) bf16 (VMEM-resident)
        x = x_ref[...]
        for h in range(num_heads):                 # static unroll
            y = jnp.dot(x, w_ref[h], preferred_element_type=jnp.float32)   # (t_seq, 3*hd)
            q_ref[h] = (y[:, :head_dim] * scale).astype(q_ref.dtype)        # fold 1/sqrt(hd)
            k_ref[h] = y[:, head_dim:2 * head_dim].astype(k_ref.dtype)
            v_ref[h] = y[:, 2 * head_dim:3 * head_dim].astype(v_ref.dtype)
    return qkv_kernel


# ----------------- kernel 2: flash causal attention (triangular grid) -----------------
def _make_flash_kernel(t_seq: int):
    def flash_kernel(qi_tbl, ki_tbl, q_ref, k_ref, v_ref, o_ref, m_sc, l_sc, acc_sc):
        step = pl.program_id(2)
        qi = qi_tbl[step]
        ki = ki_tbl[step]

        @pl.when(ki == 0)                           # first kv tile of this q row
        def _init():
            m_sc[...] = jnp.full_like(m_sc, _MASK_VALUE)
            l_sc[...] = jnp.zeros_like(l_sc)
            acc_sc[...] = jnp.zeros_like(acc_sc)

        q = q_ref[...]                              # (t_seq, hd) bf16, pre-scaled
        k = k_ref[...]                              # (t_seq, hd) bf16
        v = v_ref[...]                              # (t_seq, hd) bf16
        # Contract on the shared head_dim axis (no explicit transpose of K).
        s = lax.dot_general(q, k, dimension_numbers=(((1,), (1,)), ((), ())),
                            preferred_element_type=jnp.float32)    # (t_seq, t_seq) f32

        def online_update(scores):
            m_prev = m_sc[...]
            m_new = jnp.maximum(m_prev, jnp.max(scores, axis=-1, keepdims=True))
            alpha = jnp.exp(m_prev - m_new)
            p = jnp.exp(scores - m_new)
            l_sc[...] = alpha * l_sc[...] + jnp.sum(p, axis=-1, keepdims=True)
            acc_sc[...] = alpha * acc_sc[...] + jnp.dot(
                p.astype(v.dtype), v, preferred_element_type=jnp.float32)
            m_sc[...] = m_new

        is_diag = qi == ki                          # only diagonal tiles need a mask

        @pl.when(jnp.logical_not(is_diag))
        def _full_tile():                           # strictly below diagonal: no mask
            online_update(s)

        @pl.when(is_diag)
        def _diag_tile():
            # qi == ki and t_seq == t_kv  ->  mask is local col <= local row.
            row = lax.broadcasted_iota(jnp.int32, (t_seq, t_seq), 0)
            col = lax.broadcasted_iota(jnp.int32, (t_seq, t_seq), 1)
            online_update(jnp.where(col <= row, s, _MASK_VALUE))
            # The diagonal tile is always the LAST kv tile of this q row: finalize.
            inv_l = pl.reciprocal(l_sc[...], approx=True)    # EUP slot, ~free
            o_ref[...] = (acc_sc[...] * inv_l).astype(o_ref.dtype)

    return flash_kernel


# ------------------- kernel 3: output projection (single pass per tile) ----------------
def _make_out_proj_kernel(num_heads: int):
    def out_proj_kernel(ctx_ref, wo_ref, bo_ref, o_ref):
        # ctx_ref: (H, t_seq, hd) bf16; wo_ref: (H, hd, d_pad) bf16 resident; bo: (1, d_pad)
        acc = jnp.dot(ctx_ref[0], wo_ref[0], preferred_element_type=jnp.float32)
        for h in range(1, num_heads):               # static unroll, register accumulation
            acc = acc + jnp.dot(ctx_ref[h], wo_ref[h], preferred_element_type=jnp.float32)
        o_ref[...] = (acc + bo_ref[...]).astype(o_ref.dtype)   # lane-dense store
    return out_proj_kernel


# --------------------------------------- wrapper ---------------------------------------
def multihead_attention(x, wq, wk, wv, wo, bo, *, num_heads: int):
    """x: (B, T, d_in); wq/wk/wv: (d_in, d_out); wo: (d_out, d_out); bo: (1, d_out)."""
    B, T, d_in = x.shape
    d_out = wq.shape[1]
    assert d_out % num_heads == 0, "d_out must be divisible by num_heads"
    hd = d_out // num_heads

    cap = _tpu_vmem_capacity_bytes()
    vmem_limit = _vmem_limit_bytes(cap)
    t_seq = _seq_tile(T, cap)
    t_pad = _round_up(T, t_seq)
    n_seq = t_pad // t_seq
    d_pad = _round_up(d_out, _LANE)

    out_dtype = x.dtype
    cdt = jnp.bfloat16                 # MXU input dtype; accumulation stays f32

    # ---- host-side (one-time) layout prep ------------------------------------
    xb = x.astype(cdt)
    if t_pad != T:
        xb = jnp.pad(xb, ((0, 0), (0, t_pad - T), (0, 0)))

    def split_heads(w):                # (d_in, d_out) -> (H, d_in, hd)
        return w.reshape(d_in, num_heads, hd).transpose(1, 0, 2)

    # fused per-head QKV weight: (H, d_in, 3*hd), columns [Q | K | V]
    w_qkv = jnp.concatenate([split_heads(wq), split_heads(wk), split_heads(wv)],
                            axis=-1).astype(cdt)

    # output projection split along rows per head; pad d_out to lane-dense width
    wo_h = wo.reshape(num_heads, hd, d_out)
    bo_f = bo.astype(jnp.float32)
    if d_pad != d_out:
        wo_h = jnp.pad(wo_h, ((0, 0), (0, 0), (0, d_pad - d_out)))
        bo_f = jnp.pad(bo_f, ((0, 0), (0, d_pad - d_out)))
    wo_h = wo_h.astype(cdt)

    # ---- 1) fused QKV projection (weights resident, all heads per step) -------
    qkv_out_spec = pl.BlockSpec((pl.Squeezed(), num_heads, t_seq, hd),
                                lambda b, s: (b, 0, s, 0))
    q, k, v = pl.pallas_call(
        _make_qkv_kernel(num_heads, hd, 1.0 / math.sqrt(hd)),
        out_shape=(
            jax.ShapeDtypeStruct((B, num_heads, t_pad, hd), cdt),
            jax.ShapeDtypeStruct((B, num_heads, t_pad, hd), cdt),
            jax.ShapeDtypeStruct((B, num_heads, t_pad, hd), cdt),
        ),
        grid_spec=pltpu.PrefetchScalarGridSpec(
            num_scalar_prefetch=0,
            grid=(B, n_seq),
            in_specs=[
                pl.BlockSpec((pl.Squeezed(), t_seq, d_in), lambda b, s: (b, s, 0)),
                # full-array (VMEM-resident) fused weight: DMA'd once, not per step
                pl.BlockSpec((num_heads, d_in, 3 * hd), lambda b, s: (0, 0, 0)),
            ],
            out_specs=[qkv_out_spec, qkv_out_spec, qkv_out_spec],
        ),
        compiler_params=pltpu.CompilerParams(
            dimension_semantics=("parallel", "parallel"),
            vmem_limit_bytes=vmem_limit,
        ),
    )(xb, w_qkv)

    # ---- 2) flash attention on a flattened lower-triangle grid ----------------
    n_steps = n_seq * (n_seq + 1) // 2
    qi_np = np.zeros((n_steps,), dtype=np.int32)
    ki_np = np.zeros((n_steps,), dtype=np.int32)
    idx = 0
    for qi in range(n_seq):
        for ki in range(qi + 1):                    # row-major over the lower triangle
            qi_np[idx] = qi
            ki_np[idx] = ki
            idx += 1
    qi_tbl = jnp.asarray(qi_np)
    ki_tbl = jnp.asarray(ki_np)

    q_spec = pl.BlockSpec((pl.Squeezed(), pl.Squeezed(), t_seq, hd),
                          lambda b, h, s, qi_t, ki_t: (b, h, qi_t[s], 0))
    kv_spec = pl.BlockSpec((pl.Squeezed(), pl.Squeezed(), t_seq, hd),
                           lambda b, h, s, qi_t, ki_t: (b, h, ki_t[s], 0))

    ctx = pl.pallas_call(
        _make_flash_kernel(t_seq),
        out_shape=jax.ShapeDtypeStruct((B, num_heads, t_pad, hd), cdt),
        grid_spec=pltpu.PrefetchScalarGridSpec(
            num_scalar_prefetch=2,
            grid=(B, num_heads, n_steps),            # triangle step axis last (reduction)
            in_specs=[q_spec, kv_spec, kv_spec],
            out_specs=pl.BlockSpec((pl.Squeezed(), pl.Squeezed(), t_seq, hd),
                                   lambda b, h, s, qi_t, ki_t: (b, h, qi_t[s], 0)),
            scratch_shapes=[
                pltpu.VMEM((t_seq, 1), jnp.float32),    # running max m
                pltpu.VMEM((t_seq, 1), jnp.float32),    # running denom l
                pltpu.VMEM((t_seq, hd), jnp.float32),   # output accumulator
            ],
        ),
        compiler_params=pltpu.CompilerParams(
            dimension_semantics=("parallel", "parallel", "arbitrary"),
            vmem_limit_bytes=vmem_limit,
        ),
    )(qi_tbl, ki_tbl, q, k, v)

    # ---- 3) output projection: one step per (batch, seq-tile), resident Wo ----
    out_p = pl.pallas_call(
        _make_out_proj_kernel(num_heads),
        out_shape=jax.ShapeDtypeStruct((B, t_pad, d_pad), out_dtype),
        grid_spec=pltpu.PrefetchScalarGridSpec(
            num_scalar_prefetch=0,
            grid=(B, n_seq),
            in_specs=[
                pl.BlockSpec((pl.Squeezed(), num_heads, t_seq, hd),
                             lambda b, s: (b, 0, s, 0)),
                pl.BlockSpec((num_heads, hd, d_pad), lambda b, s: (0, 0, 0)),  # resident
                pl.BlockSpec((1, d_pad), lambda b, s: (0, 0)),                 # resident
            ],
            out_specs=pl.BlockSpec((pl.Squeezed(), t_seq, d_pad),
                                   lambda b, s: (b, s, 0)),
        ),
        compiler_params=pltpu.CompilerParams(
            dimension_semantics=("parallel", "parallel"),
            vmem_limit_bytes=vmem_limit,
        ),
    )(ctx, wo_h, bo_f)

    return out_p[:, :T, :d_out]


def _reference(x, wq, wk, wv, wo, bo, *, num_heads: int):
    """Pure-JAX f32 reference reproducing the PyTorch forward (eval mode)."""
    B, T, d_in = x.shape
    d_out = wq.shape[1]
    head_dim = d_out // num_heads

    def proj(w):
        y = jnp.einsum("btd,de->bte", x, w)
        return y.reshape(B, T, num_heads, head_dim).transpose(0, 2, 1, 3)

    q, k, v = proj(wq), proj(wk), proj(wv)
    scores = jnp.einsum("bhqd,bhkd->bhqk", q, k)
    mask = jnp.triu(jnp.ones((T, T), dtype=bool), k=1)
    scores = jnp.where(mask[None, None], -jnp.inf, scores)
    w = jax.nn.softmax(scores / math.sqrt(head_dim), axis=-1)
    ctx = jnp.einsum("bhqk,bhkd->bhqd", w, v).transpose(0, 2, 1, 3).reshape(B, T, d_out)
    return jnp.einsum("bte,ef->btf", ctx, wo) + bo[0]


if __name__ == "__main__":
    # small shapes consistent with the module's forward
    batch = 2
    seq = 8          # num_tokens (<= context_length)
    d_in = 32
    d_out = 32
    num_heads = 4
    # context_length = 16, dropout = 0.0, qkv_bias = False

    key = jax.random.PRNGKey(0)
    kx, kq, kk, kv, ko, kb = jax.random.split(key, 6)

    x = jax.random.normal(kx, (batch, seq, d_in), dtype=jnp.float32)

    # deterministic parameter init (stored as (in, out) so kernels do x @ W)
    s_in = 1.0 / math.sqrt(d_in)
    s_out = 1.0 / math.sqrt(d_out)
    wq = jax.random.uniform(kq, (d_in, d_out), jnp.float32, -s_in, s_in)
    wk = jax.random.uniform(kk, (d_in, d_out), jnp.float32, -s_in, s_in)
    wv = jax.random.uniform(kv, (d_in, d_out), jnp.float32, -s_in, s_in)
    wo = jax.random.uniform(ko, (d_out, d_out), jnp.float32, -s_out, s_out)
    bo = jax.random.uniform(kb, (1, d_out), jnp.float32, -s_out, s_out)

    out = multihead_attention(x, wq, wk, wv, wo, bo, num_heads=num_heads)
    out = jax.block_until_ready(out)

    ref = _reference(x, wq, wk, wv, wo, bo, num_heads=num_heads)
    assert out.shape == (batch, seq, d_out)
    # bf16 MXU inputs + approx reciprocal -> loosened tolerance vs f32 reference
    assert jnp.allclose(out, ref, atol=2e-2, rtol=2e-2), (
        f"mismatch vs reference, max abs err = {jnp.max(jnp.abs(out - ref))}")

    print("KERNEL_OK")
</pallas_src>

<mosaic_0001>
module attributes {stable_mosaic.version = 11 : i64} {
  func.func @qkv_kernel(%arg0: i32, %arg1: i32, %arg2: memref<1x8x32xbf16, #tpu.memory_space<vmem>>, %arg3: memref<4x32x24xbf16, #tpu.memory_space<vmem>>, %arg4: memref<1x4x8x8xbf16, #tpu.memory_space<vmem>>, %arg5: memref<1x4x8x8xbf16, #tpu.memory_space<vmem>>, %arg6: memref<1x4x8x8xbf16, #tpu.memory_space<vmem>>) attributes {dimension_semantics = [#tpu.dimension_semantics<parallel>, #tpu.dimension_semantics<parallel>], iteration_bounds = array<i64: 2, 1>, scalar_prefetch = 0 : i64, scratch_operands = 0 : i64, tpu.core_type = #tpu.core_type<tc>, window_params = [{transform_indices = @transform_0, window_bounds = array<i64: 1, 8, 32>}, {pipeline_mode = #tpu.pipeline_mode<synchronous>, transform_indices = @transform_1, window_bounds = array<i64: 4, 32, 24>}, {transform_indices = @transform_2, window_bounds = array<i64: 1, 4, 8, 8>}, {transform_indices = @transform_3, window_bounds = array<i64: 1, 4, 8, 8>}, {transform_indices = @transform_4, window_bounds = array<i64: 1, 4, 8, 8>}]} {
    %c0 = arith.constant 0 : index
    %c0_0 = arith.constant 0 : index
    %c0_1 = arith.constant 0 : index
    %0 = vector.load %arg2[%c0, %c0_0, %c0_1] : memref<1x8x32xbf16, #tpu.memory_space<vmem>>, vector<1x8x32xbf16>
    %1 = vector.shape_cast %0 : vector<1x8x32xbf16> to vector<8x32xbf16>
    %c0_2 = arith.constant 0 : index
    %c0_3 = arith.constant 0 : index
    %c0_4 = arith.constant 0 : index
    %2 = vector.load %arg3[%c0_2, %c0_3, %c0_4] : memref<4x32x24xbf16, #tpu.memory_space<vmem>>, vector<1x32x24xbf16>
    %3 = vector.shape_cast %2 : vector<1x32x24xbf16> to vector<32x24xbf16>
    %cst = arith.constant dense<0.000000e+00> : vector<8x24xf32>
    %4 = tpu.matmul %1, %3, %cst {dimension_numbers = #tpu.dot_dimension_numbers<[1], [0], [0], [1], [0, 0, 1, 1], [], []>} : vector<8x32xbf16>, vector<32x24xbf16>, vector<8x24xf32> -> vector<8x24xf32>
    %5 = vector.extract_strided_slice %4 {offsets = [0, 0], sizes = [8, 8], strides = [1, 1]} : vector<8x24xf32> to vector<8x8xf32>
    %cst_5 = arith.constant 0.353553385 : f32
    %6 = vector.broadcast %cst_5 : f32 to vector<8x8xf32>
    %7 = arith.mulf %5, %6 : vector<8x8xf32>
    %8 = arith.truncf %7 : vector<8x8xf32> to vector<8x8xbf16>
    %c0_6 = arith.constant 0 : index
    %c0_7 = arith.constant 0 : index
    %c0_8 = arith.constant 0 : index
    %c0_9 = arith.constant 0 : index
    %9 = vector.load %arg4[%c0_6, %c0_7, %c0_8, %c0_9] : memref<1x4x8x8xbf16, #tpu.memory_space<vmem>>, vector<1x1x8x8xbf16>
    %10 = vector.shape_cast %9 : vector<1x1x8x8xbf16> to vector<8x8xbf16>
    %11 = vector.shape_cast %8 : vector<8x8xbf16> to vector<1x1x8x8xbf16>
    tpu.vector_store %arg4[%c0_6, %c0_7, %c0_8, %c0_9], %11 {strides = array<i32>} : memref<1x4x8x8xbf16, #tpu.memory_space<vmem>>, vector<1x1x8x8xbf16>,
    %12 = vector.extract_strided_slice %4 {offsets = [0, 8], sizes = [8, 8], strides = [1, 1]} : vector<8x24xf32> to vector<8x8xf32>
    %13 = arith.truncf %12 : vector<8x8xf32> to vector<8x8xbf16>
    %c0_10 = arith.constant 0 : index
    %c0_11 = arith.constant 0 : index
    %c0_12 = arith.constant 0 : index
    %c0_13 = arith.constant 0 : index
    %14 = vector.load %arg5[%c0_10, %c0_11, %c0_12, %c0_13] : memref<1x4x8x8xbf16, #tpu.memory_space<vmem>>, vector<1x1x8x8xbf16>
    %15 = vector.shape_cast %14 : vector<1x1x8x8xbf16> to vector<8x8xbf16>
    %16 = vector.shape_cast %13 : vector<8x8xbf16> to vector<1x1x8x8xbf16>
    tpu.vector_store %arg5[%c0_10, %c0_11, %c0_12, %c0_13], %16 {strides = array<i32>} : memref<1x4x8x8xbf16, #tpu.memory_space<vmem>>, vector<1x1x8x8xbf16>,
    %17 = vector.extract_strided_slice %4 {offsets = [0, 16], sizes = [8, 8], strides = [1, 1]} : vector<8x24xf32> to vector<8x8xf32>
    %18 = arith.truncf %17 : vector<8x8xf32> to vector<8x8xbf16>
    %c0_14 = arith.constant 0 : index
    %c0_15 = arith.constant 0 : index
    %c0_16 = arith.constant 0 : index
    %c0_17 = arith.constant 0 : index
    %19 = vector.load %arg6[%c0_14, %c0_15, %c0_16, %c0_17] : memref<1x4x8x8xbf16, #tpu.memory_space<vmem>>, vector<1x1x8x8xbf16>
    %20 = vector.shape_cast %19 : vector<1x1x8x8xbf16> to vector<8x8xbf16>
    %21 = vector.shape_cast %18 : vector<8x8xbf16> to vector<1x1x8x8xbf16>
    tpu.vector_store %arg6[%c0_14, %c0_15, %c0_16, %c0_17], %21 {strides = array<i32>} : memref<1x4x8x8xbf16, #tpu.memory_space<vmem>>, vector<1x1x8x8xbf16>,
    %c1 = arith.constant 1 : index
    %c0_18 = arith.constant 0 : index
    %c0_19 = arith.constant 0 : index
    %22 = vector.load %arg3[%c1, %c0_18, %c0_19] : memref<4x32x24xbf16, #tpu.memory_space<vmem>>, vector<1x32x24xbf16>
    %23 = vector.shape_cast %22 : vector<1x32x24xbf16> to vector<32x24xbf16>
    %cst_20 = arith.constant dense<0.000000e+00> : vector<8x24xf32>
    %24 = tpu.matmul %1, %23, %cst_20 {dimension_numbers = #tpu.dot_dimension_numbers<[1], [0], [0], [1], [0, 0, 1, 1], [], []>} : vector<8x32xbf16>, vector<32x24xbf16>, vector<8x24xf32> -> vector<8x24xf32>
    %25 = vector.extract_strided_slice %24 {offsets = [0, 0], sizes = [8, 8], strides = [1, 1]} : vector<8x24xf32> to vector<8x8xf32>
    %cst_21 = arith.constant 0.353553385 : f32
    %26 = vector.broadcast %cst_21 : f32 to vector<8x8xf32>
    %27 = arith.mulf %25, %26 : vector<8x8xf32>
    %28 = arith.truncf %27 : vector<8x8xf32> to vector<8x8xbf16>
    %c0_22 = arith.constant 0 : index
    %c1_23 = arith.constant 1 : index
    %c0_24 = arith.constant 0 : index
    %c0_25 = arith.constant 0 : index
    %29 = vector.load %arg4[%c0_22, %c1_23, %c0_24, %c0_25] : memref<1x4x8x8xbf16, #tpu.memory_space<vmem>>, vector<1x1x8x8xbf16>
    %30 = vector.shape_cast %29 : vector<1x1x8x8xbf16> to vector<8x8xbf16>
    %31 = vector.shape_cast %28 : vector<8x8xbf16> to vector<1x1x8x8xbf16>
    tpu.vector_store %arg4[%c0_22, %c1_23, %c0_24, %c0_25], %31 {strides = array<i32>} : memref<1x4x8x8xbf16, #tpu.memory_space<vmem>>, vector<1x1x8x8xbf16>,
    %32 = vector.extract_strided_slice %24 {offsets = [0, 8], sizes = [8, 8], strides = [1, 1]} : vector<8x24xf32> to vector<8x8xf32>
    %33 = arith.truncf %32 : vector<8x8xf32> to vector<8x8xbf16>
    %c0_26 = arith.constant 0 : index
    %c1_27 = arith.constant 1 : index
    %c0_28 = arith.constant 0 : index
    %c0_29 = arith.constant 0 : index
    %34 = vector.load %arg5[%c0_26, %c1_27, %c0_28, %c0_29] : memref<1x4x8x8xbf16, #tpu.memory_space<vmem>>, vector<1x1x8x8xbf16>
    %35 = vector.shape_cast %34 : vector<1x1x8x8xbf16> to vector<8x8xbf16>
    %36 = vector.shape_cast %33 : vector<8x8xbf16> to vector<1x1x8x8xbf16>
    tpu.vector_store %arg5[%c0_26, %c1_27, %c0_28, %c0_29], %36 {strides = array<i32>} : memref<1x4x8x8xbf16, #tpu.memory_space<vmem>>, vector<1x1x8x8xbf16>,
    %37 = vector.extract_strided_slice %24 {offsets = [0, 16], sizes = [8, 8], strides = [1, 1]} : vector<8x24xf32> to vector<8x8xf32>
    %38 = arith.truncf %37 : vector<8x8xf32> to vector<8x8xbf16>
    %c0_30 = arith.constant 0 : index
    %c1_31 = arith.constant 1 : index
    %c0_32 = arith.constant 0 : index
    %c0_33 = arith.constant 0 : index
    %39 = vector.load %arg6[%c0_30, %c1_31, %c0_32, %c0_33] : memref<1x4x8x8xbf16, #tpu.memory_space<vmem>>, vector<1x1x8x8xbf16>
    %40 = vector.shape_cast %39 : vector<1x1x8x8xbf16> to vector<8x8xbf16>
    %41 = vector.shape_cast %38 : vector<8x8xbf16> to vector<1x1x8x8xbf16>
    tpu.vector_store %arg6[%c0_30, %c1_31, %c0_32, %c0_33], %41 {strides = array<i32>} : memref<1x4x8x8xbf16, #tpu.memory_space<vmem>>, vector<1x1x8x8xbf16>,
    %c2 = arith.constant 2 : index
    %c0_34 = arith.constant 0 : index
    %c0_35 = arith.constant 0 : index
    %42 = vector.load %arg3[%c2, %c0_34, %c0_35] : memref<4x32x24xbf16, #tpu.memory_space<vmem>>, vector<1x32x24xbf16>
    %43 = vector.shape_cast %42 : vector<1x32x24xbf16> to vector<32x24xbf16>
    %cst_36 = arith.constant dense<0.000000e+00> : vector<8x24xf32>
    %44 = tpu.matmul %1, %43, %cst_36 {dimension_numbers = #tpu.dot_dimension_numbers<[1], [0], [0], [1], [0, 0, 1, 1], [], []>} : vector<8x32xbf16>, vector<32x24xbf16>, vector<8x24xf32> -> vector<8x24xf32>
    %45 = vector.extract_strided_slice %44 {offsets = [0, 0], sizes = [8, 8], strides = [1, 1]} : vector<8x24xf32> to vector<8x8xf32>
    %cst_37 = arith.constant 0.353553385 : f32
    %46 = vector.broadcast %cst_37 : f32 to vector<8x8xf32>
    %47 = arith.mulf %45, %46 : vector<8x8xf32>
    %48 = arith.truncf %47 : vector<8x8xf32> to vector<8x8xbf16>
    %c0_38 = arith.constant 0 : index
    %c2_39 = arith.constant 2 : index
    %c0_40 = arith.constant 0 : index
    %c0_41 = arith.constant 0 : index
    %49 = vector.load %arg4[%c0_38, %c2_39, %c0_40, %c0_41] : memref<1x4x8x8xbf16, #tpu.memory_space<vmem>>, vector<1x1x8x8xbf16>
    %50 = vector.shape_cast %49 : vector<1x1x8x8xbf16> to vector<8x8xbf16>
    %51 = vector.shape_cast %48 : vector<8x8xbf16> to vector<1x1x8x8xbf16>
    tpu.vector_store %arg4[%c0_38, %c2_39, %c0_40, %c0_41], %51 {strides = array<i32>} : memref<1x4x8x8xbf16, #tpu.memory_space<vmem>>, vector<1x1x8x8xbf16>,
    %52 = vector.extract_strided_slice %44 {offsets = [0, 8], sizes = [8, 8], strides = [1, 1]} : vector<8x24xf32> to vector<8x8xf32>
    %53 = arith.truncf %52 : vector<8x8xf32> to vector<8x8xbf16>
    %c0_42 = arith.constant 0 : index
    %c2_43 = arith.constant 2 : index
    %c0_44 = arith.constant 0 : index
    %c0_45 = arith.constant 0 : index
    %54 = vector.load %arg5[%c0_42, %c2_43, %c0_44, %c0_45] : memref<1x4x8x8xbf16, #tpu.memory_space<vmem>>, vector<1x1x8x8xbf16>
    %55 = vector.shape_cast %54 : vector<1x1x8x8xbf16> to vector<8x8xbf16>
    %56 = vector.shape_cast %53 : vector<8x8xbf16> to vector<1x1x8x8xbf16>
    tpu.vector_store %arg5[%c0_42, %c2_43, %c0_44, %c0_45], %56 {strides = array<i32>} : memref<1x4x8x8xbf16, #tpu.memory_space<vmem>>, vector<1x1x8x8xbf16>,
    %57 = vector.extract_strided_slice %44 {offsets = [0, 16], sizes = [8, 8], strides = [1, 1]} : vector<8x24xf32> to vector<8x8xf32>
    %58 = arith.truncf %57 : vector<8x8xf32> to vector<8x8xbf16>
    %c0_46 = arith.constant 0 : index
    %c2_47 = arith.constant 2 : index
    %c0_48 = arith.constant 0 : index
    %c0_49 = arith.constant 0 : index
    %59 = vector.load %arg6[%c0_46, %c2_47, %c0_48, %c0_49] : memref<1x4x8x8xbf16, #tpu.memory_space<vmem>>, vector<1x1x8x8xbf16>
    %60 = vector.shape_cast %59 : vector<1x1x8x8xbf16> to vector<8x8xbf16>
    %61 = vector.shape_cast %58 : vector<8x8xbf16> to vector<1x1x8x8xbf16>
    tpu.vector_store %arg6[%c0_46, %c2_47, %c0_48, %c0_49], %61 {strides = array<i32>} : memref<1x4x8x8xbf16, #tpu.memory_space<vmem>>, vector<1x1x8x8xbf16>,
    %c3 = arith.constant 3 : index
    %c0_50 = arith.constant 0 : index
    %c0_51 = arith.constant 0 : index
    %62 = vector.load %arg3[%c3, %c0_50, %c0_51] : memref<4x32x24xbf16, #tpu.memory_space<vmem>>, vector<1x32x24xbf16>
    %63 = vector.shape_cast %62 : vector<1x32x24xbf16> to vector<32x24xbf16>
    %cst_52 = arith.constant dense<0.000000e+00> : vector<8x24xf32>
    %64 = tpu.matmul %1, %63, %cst_52 {dimension_numbers = #tpu.dot_dimension_numbers<[1], [0], [0], [1], [0, 0, 1, 1], [], []>} : vector<8x32xbf16>, vector<32x24xbf16>, vector<8x24xf32> -> vector<8x24xf32>
    %65 = vector.extract_strided_slice %64 {offsets = [0, 0], sizes = [8, 8], strides = [1, 1]} : vector<8x24xf32> to vector<8x8xf32>
    %cst_53 = arith.constant 0.353553385 : f32
    %66 = vector.broadcast %cst_53 : f32 to vector<8x8xf32>
    %67 = arith.mulf %65, %66 : vector<8x8xf32>
    %68 = arith.truncf %67 : vector<8x8xf32> to vector<8x8xbf16>
    %c0_54 = arith.constant 0 : index
    %c3_55 = arith.constant 3 : index
    %c0_56 = arith.constant 0 : index
    %c0_57 = arith.constant 0 : index
    %69 = vector.load %arg4[%c0_54, %c3_55, %c0_56, %c0_57] : memref<1x4x8x8xbf16, #tpu.memory_space<vmem>>, vector<1x1x8x8xbf16>
    %70 = vector.shape_cast %69 : vector<1x1x8x8xbf16> to vector<8x8xbf16>
    %71 = vector.shape_cast %68 : vector<8x8xbf16> to vector<1x1x8x8xbf16>
    tpu.vector_store %arg4[%c0_54, %c3_55, %c0_56, %c0_57], %71 {strides = array<i32>} : memref<1x4x8x8xbf16, #tpu.memory_space<vmem>>, vector<1x1x8x8xbf16>,
    %72 = vector.extract_strided_slice %64 {offsets = [0, 8], sizes = [8, 8], strides = [1, 1]} : vector<8x24xf32> to vector<8x8xf32>
    %73 = arith.truncf %72 : vector<8x8xf32> to vector<8x8xbf16>
    %c0_58 = arith.constant 0 : index
    %c3_59 = arith.constant 3 : index
    %c0_60 = arith.constant 0 : index
    %c0_61 = arith.constant 0 : index
    %74 = vector.load %arg5[%c0_58, %c3_59, %c0_60, %c0_61] : memref<1x4x8x8xbf16, #tpu.memory_space<vmem>>, vector<1x1x8x8xbf16>
    %75 = vector.shape_cast %74 : vector<1x1x8x8xbf16> to vector<8x8xbf16>
    %76 = vector.shape_cast %73 : vector<8x8xbf16> to vector<1x1x8x8xbf16>
    tpu.vector_store %arg5[%c0_58, %c3_59, %c0_60, %c0_61], %76 {strides = array<i32>} : memref<1x4x8x8xbf16, #tpu.memory_space<vmem>>, vector<1x1x8x8xbf16>,
    %77 = vector.extract_strided_slice %64 {offsets = [0, 16], sizes = [8, 8], strides = [1, 1]} : vector<8x24xf32> to vector<8x8xf32>
    %78 = arith.truncf %77 : vector<8x8xf32> to vector<8x8xbf16>
    %c0_62 = arith.constant 0 : index
    %c3_63 = arith.constant 3 : index
    %c0_64 = arith.constant 0 : index
    %c0_65 = arith.constant 0 : index
    %79 = vector.load %arg6[%c0_62, %c3_63, %c0_64, %c0_65] : memref<1x4x8x8xbf16, #tpu.memory_space<vmem>>, vector<1x1x8x8xbf16>
    %80 = vector.shape_cast %79 : vector<1x1x8x8xbf16> to vector<8x8xbf16>
    %81 = vector.shape_cast %78 : vector<8x8xbf16> to vector<1x1x8x8xbf16>
    tpu.vector_store %arg6[%c0_62, %c3_63, %c0_64, %c0_65], %81 {strides = array<i32>} : memref<1x4x8x8xbf16, #tpu.memory_space<vmem>>, vector<1x1x8x8xbf16>,
    return
  }
  func.func @transform_0(%arg0: i32, %arg1: i32) -> (i32, i32, i32) {
    %c0_i32 = arith.constant 0 : i32
    %c0_i32_0 = arith.constant 0 : i32
    return %arg0, %arg1, %c0_i32 : i32, i32, i32
  }
  func.func @transform_1(%arg0: i32, %arg1: i32) -> (i32, i32, i32) {
    %c0_i32 = arith.constant 0 : i32
    %c0_i32_0 = arith.constant 0 : i32
    %c0_i32_1 = arith.constant 0 : i32
    %c0_i32_2 = arith.constant 0 : i32
    return %c0_i32, %c0_i32_0, %c0_i32_1 : i32, i32, i32
  }
  func.func @transform_2(%arg0: i32, %arg1: i32) -> (i32, i32, i32, i32) {
    %c0_i32 = arith.constant 0 : i32
    %c0_i32_0 = arith.constant 0 : i32
    %c0_i32_1 = arith.constant 0 : i32
    return %arg0, %c0_i32, %arg1, %c0_i32_0 : i32, i32, i32, i32
  }
  func.func @transform_3(%arg0: i32, %arg1: i32) -> (i32, i32, i32, i32) {
    %c0_i32 = arith.constant 0 : i32
    %c0_i32_0 = arith.constant 0 : i32
    %c0_i32_1 = arith.constant 0 : i32
    return %arg0, %c0_i32, %arg1, %c0_i32_0 : i32, i32, i32, i32
  }
  func.func @transform_4(%arg0: i32, %arg1: i32) -> (i32, i32, i32, i32) {
    %c0_i32 = arith.constant 0 : i32
    %c0_i32_0 = arith.constant 0 : i32
    %c0_i32_1 = arith.constant 0 : i32
    return %arg0, %c0_i32, %arg1, %c0_i32_0 : i32, i32, i32, i32
  }
}

</mosaic_0001>

<bundles_post_ra>
// kernel: tpu_custom_call.1
= control target key start
LH: loop header
LB: loop body
LE: loop exit
PB: predicated region body
PF: predicated region fallthrough
CT: control target
= control target key end

     0   :  { %10 = vsyncpa [#allocation3], 0  ;;  %s1364_s0 = inlined_call_operand.vmem [shape: bf16[2,8,32], index: 0, kind: input, shape index: {}]   ;;  %s1365_s1 = inlined_call_operand.vmem [shape: bf16[4,32,24], index: 1, kind: input, shape index: {}]   ;;  %s1366_s2 = inlined_call_operand.hbm [shape: bf16[2,4,8,8], index: 2, kind: output, shape index: {0}]   ;;  %s1367_s3 = inlined_call_operand.hbm [shape: bf16[2,4,8,8], index: 3, kind: output, shape index: {1}]   ;;  %s1368_s4 = inlined_call_operand.hbm [shape: bf16[2,4,8,8], index: 4, kind: output, shape index: {2}]  }
   0x1   :  { %12 = vsyncpa [#allocation3 + $0x1], 0 }
   0x2   :  { %13 = vsyncpa [#allocation5], 0 }
   0x3   :  { %15 = vsyncpa [#allocation5 + $0x1], 0  ;;  %s1097_s15 = smov 0   ;;  %s1099_s16 = smov 0  }
   0x4   :  { %s1101_s17 = smov 0   ;;  %s1103_s18 = smov 0  }
   0x5   :  { %s1105_s19 = smov 0   ;;  %s1107_s20 = smov 0  }
   0x6 LB: > { %s742_s21 = sadd.s32 4294967295, %s1061_s20   ;;  %s1369_s22 = sadd.s32 4294967294, %s1061_s20   ;;  %s1061_s20 = sphi %s1107_s20, %s21_s20   ;;  %s1057_s19 = sphi %s1105_s19, %s1378_s19   ;;  %s1053_s18 = sphi %s1103_s18, %s1377_s18   ;;  %s1049_s17 = sphi %s1101_s17, %s1376_s17   ;;  %s1045_s16 = sphi %s1099_s16, %s1375_s16   ;;  %s1041_s15 = sphi %s1097_s15, %s1374_s15  }
   0x7   : > { %s33_s23 = sadd.s32 1, %s1057_s19  ;;  %s91_s24 = sadd.s32 1, %s1049_s17 }
   0x8   : > { %p35_p0 = scmp.ge.s32.totalorder %s33_s23, 2  ;;  %p101_p1 = scmp.ne.s32.totalorder %s1049_s17, %s1045_s16 }
   0x9   : > { %p102_p2 = scmp.eq.s32.totalorder %s742_s21, 1  ;;  %p107_p3 = scmp.ne.s32.totalorder %s1045_s16, %s1041_s15 }
   0xa   : > { %s1380_s23 = smov (%p35_p0, %s33_s23), 0  ;;  %p108_p5 = scmp.eq.s32.totalorder %s1369_s22, 1 }
   0xb   : > { %p1139_p4 = por %p102_p2, %p101_p1  ;;  %s86_s26 = ssub.s32 %s1057_s19, %s1380_s23 }
   0xc   : > { %p746_p6 = scmp.ge.s32.totalorder %s1061_s20, 1  ;;  %p89_p7 = scmp.eq.s32.totalorder %s86_s26, 0 }
   0xd   : > { %p1148_p8 = por %p108_p5, %p107_p3  ;;  %p195_p9 = scmp.lt.s32.totalorder %s1061_s20, 3 }
   0xe   : > { %s1154_s28 = scalar_select %p89_p7, %s1049_s17, %s91_s24  }
   0xf   : > { %p196_p10 = pnand %p746_p6, %p195_p9 }
  0x10   : > { %p233_p11 = scmp.lt.s32.totalorder (!%p196_p10), %s1053_s18, 1  ;;  %s216_s10 = sand.u32 (!%p196_p10), 1, %s1045_s16  }
  0x11   : > { %199 = sbr.rel (%p196_p10) target bundleno = 388 (0x184), region = 28  ;;  %s1066_s13 = smov (!%p196_p10), 112  }
  0x12   : > { %s1205_s26 = sshll.u32 (!%p196_p10), %s1053_s18, 8  ;;  %s1223_s5 = scalar_lea.sflag (!%p196_p10), [#allocation3], %s216_s10 }
  0x13   : > { %s1216_s30 = scalar_lea.hbm (!%p196_p10), %s1366_s2, %s1205_s26  ;;  %s1067_s7 = smov (!%p196_p10), [#allocation2]  }
  0x14   : > { %s933_s8 = sshll.u32 (!%p196_p10), %s1067_s7, 4  ;;  %s934_s8 = int_to_ptr.vmem [resolvable:$false] %s933_s8 }
  0x15   : > { %s935_s9 = scalar_lea.vmem (!%p196_p10), %s934_s8, 512 }
  0x16   : > { %v921_v0 = vld [vmem:[%s1365_s1 + $0x8] sm:$0xff]   ;;  %v1063_v1 = vmov 0.0   ;;  %v922_v2 = vld [vmem:[%s1365_s1 + $0x18] sm:$0xff]   ;;  %v923_v3 = vld [vmem:[%s1365_s1] sm:$0xff]   ;;  %vm1064_vm0 = vmmov 0   ;;  %s234_s11 = scalar_select %p233_p11, %s1053_s18, 1 }
  0x17   : > { %818 = vmatprep.subr.bf16.mxu0 %v1063_v1  ;;  %826 = vmatprep.subr.bf16.mxu1 %v1063_v1  ;;  %v924_v4 = vld [vmem:[%s1365_s1 + $0x10] sm:$0xff]   ;;  %vm258_vm1 = vcmask 261120   ;;  %v925_v5 = vld [vmem:[%s1365_s1 + $0x28] sm:$0xff]   ;;  %v926_v6 = vld [vmem:[%s1365_s1 + $0x38] sm:$0xff]   ;;  %vm304_vm2 = vcmask 60416  }
  0x18   : > { %819 = vmatpush3.bf16.msra.mxu0 %v921_v0  ;;  %822 = vmatprep.mubr.msk.bf16.mxu0 %vm1064_vm0, %v1063_v1  ;;  %s750_s12 = sshll.u32 %s234_s11, 2  ;;  %v927_v8 = vld [vmem:[%s1365_s1 + $0x20] sm:$0xff]   ;;  %v928_v9 = vld [vmem:[%s1365_s1 + $0x30] sm:$0xff]   ;;  %s1196_s11 = sshll.u32 %s216_s10, 4 }
  0x19   : > { %827 = vmatpush3.bf16.msra.mxu1 %v922_v2  ;;  %820 = vmatprep.subr.bf16.mxu0 %v1063_v1  ;;  %s239_s29 = scalar_lea.vmem %s1364_s0, %s750_s12  ;;  %s1065_s12 = smov 120  }
  0x1a   : > { %828 = vmatprep.subr.bf16.mxu1 %v1063_v1  ;;  %830 = vmatprep.mubr.msk.bf16.mxu1 %vm1064_vm0, %v1063_v1  ;;  %v241_v7 = vld [vmem:[%s239_s29] sm:$0xf]  ;;  %s218_s14 = scalar_lea.vmem [#allocation2], %s1196_s11 }
  0x1b   : > { %s568_s24 = sshll.u32 %s218_s14, 4  ;;  %s1209_s24 = int_to_ptr.vmem [resolvable:$true] %s568_s24 }
  0x1c   : > { %821 = vmatpush3.bf16.msra.mxu0 %v923_v3  ;;  %s929_s6 = scalar_lea.vmem %s1209_s24, 256  ;;  %p936_p1 = scmp.lt.s32.totalorder %s1209_s24, %s934_s8 }
  0x1d   : > { %829 = vmatpush3.bf16.msra.mxu1 %v924_v4  ;;  %834 = vmatprep.subr.bf16.mxu0 %v1063_v1  ;;  %p930_p12 = scmp.ne.s32.totalorder %s1209_s24, %s929_s6  ;;  %p937_p2 = scmp.lt.s32.totalorder %s935_s9, %s929_s6 }
  0x1e   : > { %842 = vmatprep.subr.bf16.mxu1 %v1063_v1 }
  0x1f   : > { %823 = vmatmul.mubr.msk.bf16.vlgmr.msra.gmra.mxu0 %vm258_vm1, %v241_v7  ;;  %p931_p13 = pnand %p930_p12, %p1139_p4  ;;  %p938_p3 = por %p937_p2, %p936_p1 }
  0x20   : > { %831 = vmatmul.mubr.msk.bf16.vlgmr.msra.gmra.mxu1 %vm258_vm1, %v241_v7  ;;  %835 = vmatpush3.bf16.msra.mxu0 %v925_v5 }
  0x21   : > { %843 = vmatpush3.bf16.msra.mxu1 %v926_v6  ;;  %836 = vmatprep.subr.bf16.mxu0 %v1063_v1  ;;  %p932_p0 = pneg %p931_p13 }
  0x22   : > { %844 = vmatprep.subr.bf16.mxu1 %v1063_v1  ;;  %838 = vmatprep.mubr.msk.bf16.mxu0 %vm1064_vm0, %v1063_v1 }
  0x23   : > { %846 = vmatprep.mubr.msk.bf16.mxu1 %vm1064_vm0, %v1063_v1  ;;  %p939_p5 = pnand %p938_p3, %p932_p0 }
  0x24   : > { %837 = vmatpush3.bf16.msra.mxu0 %v927_v8 }
  0x25   : > { %845 = vmatpush3.bf16.msra.mxu1 %v928_v9 }
  0x27   : > { %839 = vmatmul.mubr.msk.bf16.vlgmr.msra.gmra.mxu0 %vm258_vm1, %v241_v7 }
  0x28   : > { %847 = vmatmul.mubr.msk.bf16.vlgmr.msra.gmra.mxu1 %vm258_vm1, %v241_v7 }
  0xdf   : > { %v296_v10 = vpop.f32.mrf.mxu0 }
  0xe0   : > { %v302_v11 = vmul.f32 0.35355338, %v296_v10  ;;  %v369_v12 = vpop.f32.mrf.mxu1  ;;  %v799_v13 = vpack.c.bf16 %v296_v10, %v296_v10 }
  0xe1   : > { %v375_v14 = vmul.f32 0.35355338, %v369_v12  ;;  %v824_v15 = vpop.f32.mrf.mxu0  ;;  %v800_v16 = vpack.c.bf16 %v369_v12, %v369_v12 }
  0xe2   : > { %v303_v17 = vpack.c.bf16 %v302_v11, %v302_v11  ;;  %v832_v18 = vpop.f32.mrf.mxu1  ;;  %310 = vrot.lane.b32.xlu0 %v799_v13, %s1065_s12 }
  0xe3   : > { %v376_v19 = vpack.c.bf16 %v375_v14, %v375_v14  ;;  %v299_v20 = vpop.f32.mrf.mxu0  ;;  %388 = vrot.lane.b32.xlu1 %v800_v16, %s1066_s13 }
  0xe4   : > { %305 = vst.msk [vmem:[%s218_s14] sm:$0xf] %vm304_vm2, %v303_v17  ;;  %v372_v21 = vpop.f32.mrf.mxu1 }
  0xe5   : > { %762 = vst.msk [vmem:[%s218_s14 + $0x4] sm:$0xf] %vm304_vm2, %v376_v19  ;;  %v825_v22 = vpop.f32.mrf.mxu0 }
  0xe6   : > { %v833_v23 = vpop.f32.mrf.mxu1  ;;  %383 = vrot.lane.b32.xlu0 %v800_v16, %s1065_s12 }
  0xe7   : > { %v444_v24 = vpop.f32.mrf.mxu0 }
  0xe8   : > { %v450_v25 = vmul.f32 0.35355338, %v444_v24  ;;  %v801_v26 = vpack.c.bf16 %v444_v24, %v444_v24  ;;  %v519_v27 = vpop.f32.mrf.mxu1 }
  0xe9   : > { %v525_v28 = vmul.f32 0.35355338, %v519_v27  ;;  %v840_v29 = vpop.f32.mrf.mxu0  ;;  %v802_v31 = vpack.c.bf16 %v519_v27, %v519_v27 }
  0xea   : > { %v451_v30 = vpack.c.bf16 %v450_v25, %v450_v25  ;;  %v848_v32 = vpop.f32.mrf.mxu1  ;;  %314 = vrot.lane.b32.xlu0 %v799_v13, %s1066_s13  ;;  %458 = vrot.lane.b32.xlu1 %v801_v26, %s1065_s12 }
  0xeb   : > { %v526_v33 = vpack.c.bf16 %v525_v28, %v525_v28  ;;  %v447_v34 = vpop.f32.mrf.mxu0 }
  0xec   : > { %773 = vst.msk [vmem:[%s218_s14 + $0x8] sm:$0xf] %vm304_vm2, %v451_v30  ;;  %v522_v35 = vpop.f32.mrf.mxu1 }
  0xed   : > { %784 = vst.msk [vmem:[%s218_s14 + $0xc] sm:$0xf] %vm304_vm2, %v526_v33  ;;  %v841_v36 = vpop.f32.mrf.mxu0 }
  0xee   : > { %v849_v37 = vpop.f32.mrf.mxu1  ;;  %463 = vrot.lane.b32.xlu0 %v801_v26, %s1066_s13  ;;  %533 = vrot.lane.b32.xlu1 %v802_v31, %s1065_s12 }
  0xef   : > { %942 = shalt.err (!%p939_p5)
}
  0xf0   : > { %s943_s10 = scalar_lea.hbm %s1216_s30, 256  ;;  %s947_s18 = scalar_lea.hbm %s1366_s2, 512 }
  0xf1   : > { %p944_p6 = scmp.ne.s32.totalorder %s1216_s30, %s943_s10  ;;  %p948_p10 = scmp.lt.s32.totalorder %s1216_s30, %s1366_s2 }
  0xf2   : > { %p949_p11 = scmp.lt.s32.totalorder %s947_s18, %s943_s10 }
  0xf3   : > { %p945_p7 = pnand %p944_p6, %p1139_p4 }
  0xf4   : > { %p950_p12 = por %p949_p11, %p948_p10 }
  0xf5   : > { %p946_p9 = pneg %p945_p7 }
  0xf7   : > { %p951_p13 = pnand %p950_p12, %p946_p9 }
  0xf9   : > { %954 = shalt.err (!%p951_p13)
}
  0xfa   : > { %s1068_s6 = smov 64   ;;  %s1069_s8 = smov 4   ;;  %538 = vrot.lane.b32.xlu1 %v802_v31, %s1066_s13 }
  0xfb   : > { %850 = dma.vmem_to_hbm [thread:$0]  (%p1139_p4), %s1209_s24, 256, %s1216_s30, %s1223_s5, %s1068_s6, %s1068_s6, %s1069_s8  }
  0xfc   : > { %s225_s9 = scalar_lea.vmem [#allocation4], %s1196_s11  ;;  %s1253_s10 = scalar_lea.vmem [#allocation6], %s1196_s11 }
  0xfd   : > { %s585_s24 = sshll.u32 %s225_s9, 4  ;;  %s1260_s13 = sand.u32 1, %s742_s21   ;;  %s1265_s24 = int_to_ptr.vmem [resolvable:$true] %s585_s24 }
  0xfe   : > { %s1271_s5 = scalar_lea.hbm %s1367_s3, %s1205_s26  ;;  %s549_s21 = scalar_lea.sflag [#allocation5], %s1260_s13 }
  0xff   : > { %s955_s14 = scalar_lea.vmem %s1265_s24, 256  ;;  %s1070_s18 = smov [#allocation4]  }
 0x100   : > { %p956_p0 = scmp.ne.s32.totalorder %s1265_s24, %s955_s14  ;;  %s959_s29 = sshll.u32 %s1070_s18, 4  ;;  %s960_s29 = int_to_ptr.vmem [resolvable:$false] %s959_s29 }
 0x101   : > { %s961_s7 = scalar_lea.vmem %s960_s29, 512  ;;  %p962_p3 = scmp.lt.s32.totalorder %s1265_s24, %s960_s29 }
 0x102   : > { %p957_p1 = pnand %p956_p0, %p1139_p4  ;;  %p963_p5 = scmp.lt.s32.totalorder %s961_s7, %s955_s14 }
 0x104   : > { %p958_p2 = pneg %p957_p1  ;;  %p964_p6 = por %p963_p5, %p962_p3 }
 0x106   : > { %p965_p7 = pnand %p964_p6, %p958_p2 }
 0x154   : > { %v311_v38 = vpop.permute.xlu0 %310 }
 0x155   : > { %313 = vst.msk [vmem:[%s225_s9] sm:$0xf] %vm304_vm2, %v311_v38  ;;  %v389_v39 = vpop.permute.xlu1 %388 }
 0x156   : > { %765 = vst.msk [vmem:[%s1253_s10 + $0x4] sm:$0xf] %vm304_vm2, %v389_v39 }
 0x158   : > { %v384_v40 = vpop.permute.xlu0 %383 }
 0x159   : > { %764 = vst.msk [vmem:[%s225_s9 + $0x4] sm:$0xf] %vm304_vm2, %v384_v40 }
 0x15c   : > { %v315_v41 = vpop.permute.xlu0 %314  ;;  %v459_v42 = vpop.permute.xlu1 %458 }
 0x15d   : > { %317 = vst.msk [vmem:[%s1253_s10] sm:$0xf] %vm304_vm2, %v315_v41  ;;  %775 = vst.msk [vmem:[%s225_s9 + $0x8] sm:$0xf] %vm304_vm2, %v459_v42 }
 0x160   : > { %v464_v43 = vpop.permute.xlu0 %463  ;;  %v534_v44 = vpop.permute.xlu1 %533 }
 0x161   : > { %776 = vst.msk [vmem:[%s1253_s10 + $0x8] sm:$0xf] %vm304_vm2, %v464_v43  ;;  %786 = vst.msk [vmem:[%s225_s9 + $0xc] sm:$0xf] %vm304_vm2, %v534_v44 }
 0x162   : > { %968 = shalt.err (!%p965_p7)
}
 0x163   : > { %s969_s9 = scalar_lea.hbm %s1271_s5, 256  ;;  %s973_s18 = scalar_lea.hbm %s1367_s3, 512 }
 0x164   : > { %p970_p9 = scmp.ne.s32.totalorder %s1271_s5, %s969_s9  ;;  %p974_p12 = scmp.lt.s32.totalorder %s1271_s5, %s1367_s3 }
 0x165   : > { %p975_p13 = scmp.lt.s32.totalorder %s973_s18, %s969_s9 }
 0x166   : > { %p971_p10 = pnand %p970_p9, %p1139_p4 }
 0x167   : > { %p976_p0 = por %p975_p13, %p974_p12 }
 0x168   : > { %p972_p11 = pneg %p971_p10 }
 0x16a   : > { %p977_p1 = pnand %p976_p0, %p972_p11 }
 0x16c   : > { %980 = shalt.err (!%p977_p1)
}
 0x16d   : > { %851 = dma.vmem_to_hbm [thread:$0]  (%p1139_p4), %s1265_s24, 256, %s1271_s5, %s549_s21, %s1068_s6, %s1068_s6, %s1069_s8   ;;  %v539_v45 = vpop.permute.xlu1 %538 }
 0x16e   : > { %s1372_s22 = sshll.u32 %s1253_s10, 4  ;;  %s1311_s29 = scalar_lea.hbm %s1368_s4, %s1205_s26  ;;  %787 = vst.msk [vmem:[%s1253_s10 + $0xc] sm:$0xf] %vm304_vm2, %v539_v45  ;;  %s1305_s22 = int_to_ptr.vmem [resolvable:$true] %s1372_s22 }
 0x16f   : > { %s981_s7 = scalar_lea.vmem %s1305_s22, 256  ;;  %s1071_s24 = smov [#allocation6]  }
 0x170   : > { %p982_p2 = scmp.ne.s32.totalorder %s1305_s22, %s981_s7  ;;  %s985_s5 = sshll.u32 %s1071_s24, 4  ;;  %s986_s5 = int_to_ptr.vmem [resolvable:$false] %s985_s5 }
 0x171   : > { %s987_s9 = scalar_lea.vmem %s986_s5, 512  ;;  %p988_p6 = scmp.lt.s32.totalorder %s1305_s22, %s986_s5 }
 0x172   : > { %p983_p3 = pnand %p982_p2, %p1139_p4  ;;  %p989_p7 = scmp.lt.s32.totalorder %s987_s9, %s981_s7 }
 0x174   : > { %p984_p5 = pneg %p983_p3  ;;  %p990_p9 = por %p989_p7, %p988_p6 }
 0x176   : > { %p991_p10 = pnand %p990_p9, %p984_p5 }
 0x178   : > { %994 = shalt.err (!%p991_p10)
}
 0x179   : > { %s995_s26 = scalar_lea.hbm %s1311_s29, 256  ;;  %s999_s30 = scalar_lea.hbm %s1368_s4, 512 }
 0x17a   : > { %p996_p11 = scmp.ne.s32.totalorder %s1311_s29, %s995_s26  ;;  %p1000_p0 = scmp.lt.s32.totalorder %s1311_s29, %s1368_s4 }
 0x17b   : > { %p1001_p1 = scmp.lt.s32.totalorder %s999_s30, %s995_s26 }
 0x17c   : > { %p997_p12 = pnand %p996_p11, %p1139_p4 }
 0x17d   : > { %p1002_p2 = por %p1001_p1, %p1000_p0 }
 0x17e   : > { %p998_p13 = pneg %p997_p12 }
 0x180   : > { %p1003_p3 = pnand %p1002_p2, %p998_p13 }
 0x182   : > { %1006 = shalt.err (!%p1003_p3)
}
 0x183   : > { %852 = dma.vmem_to_hbm [thread:$0]  (%p1139_p4), %s1305_s22, 256, %s1311_s29, %s549_s21, %s1068_s6, %s1068_s6, %s1069_s8  }
 0x184 PF: > { %p866_p5 = scmp.ge.s32.totalorder %s1061_s20, 2  ;;  %s617_s14 = sand.u32 1, %s1041_s15  }
 0x185   : > { %s618_s7 = scalar_lea.sflag [#allocation3], %s617_s14 }
 0x186   : > { %p857_p6 = pnand %p866_p5, %p1148_p8 }
 0x188   : > { %p858_p7 = pneg %p857_p6 }
 0x18a   : > { %1032 = dma.done.wait (%p858_p7), %s618_s7, 256  }
 0x18b   : > { %1034 = vsyncadd (%p858_p7), %s618_s7, 4294967040  ;;  %s1373_s25 = sadd.s32 4294967294, %s1061_s20  }
 0x18c   : > { %s626_s24 = sand.u32 1, %s1373_s25  }
 0x18d   : > { %s627_s5 = scalar_lea.sflag [#allocation5], %s626_s24 }
 0x18e   : > { %1036 = dma.done.wait (%p858_p7), %s627_s5, 512  }
 0x18f   : > { %1038 = vsyncadd (%p858_p7), %s627_s5, 4294966784  ;;  %s21_s20 = sadd.s32 1, %s1061_s20   ;;  %s1374_s15 = smov %s1045_s16 }
 0x190   : > { %p18_p4 = scmp.ge.s32.totalorder %s21_s20, 4   ;;  %s1375_s16 = smov %s1049_s17 }
 0x191   : > { %s1376_s17 = smov %s1154_s28  ;;  %s1377_s18 = smov %s1057_s19 }
 0x192   : > { %s1378_s19 = smov %s1380_s23  ;;  %20 = sbr.rel (!%p18_p4) target bundleno = 6 (0x6), region = 107 }
 0x197   :  { %641 = vsyncpa [#allocation3], 1 }
 0x198   :  { %643 = vsyncpa [#allocation3 + $0x1], 1 }
 0x199   :  { %644 = vsyncpa [#allocation5], 1 }
 0x19a   :  { %646 = vsyncpa [#allocation5 + $0x1], 1 }

</bundles_post_ra>
